<compile_context>
chip_gen: v5e
topology: v5e:2x2
jax: 0.10.0
libtpu: 0.0.40
codegen_flags: <defaults>
</compile_context>

<pallas_src>
import jax
import jax.numpy as jnp
from jax.experimental import pallas as pl
from jax.experimental.pallas import tpu as pltpu

_LANE = 128


def _round_up(a: int, b: int) -> int:
    return ((a + b - 1) // b) * b


def _sublane(dtype) -> int:
    # Native vreg tiles: (8,128) for 4-byte, (16,128) for 2-byte, (32,128) for
    # 1-byte dtypes (sub-32-bit packs along sublanes).
    itemsize = jnp.dtype(dtype).itemsize
    return max(8, 32 // max(itemsize, 1))


def _tpu_generation():
    try:
        kind = jax.devices()[0].device_kind.lower()
    except Exception:
        return None
    if "tpu" not in kind:
        return None
    if "7" in kind:
        return 7
    if "v6" in kind or "6e" in kind:
        return 6
    if "v5" in kind or "5e" in kind or "5p" in kind:
        return 5
    if "v4" in kind:
        return 4
    return None


def _device_profile():
    """(dual_tc, block_bytes, vmem_limit_bytes_or_None, native_half_compute)."""
    gen = _tpu_generation()
    dual_tc = gen is not None and gen >= 7
    if dual_tc:
        block_bytes = 6 * 1024 * 1024        # 2in+2out x 6 MiB = 24 MiB
        vmem_limit = 40 * 1024 * 1024        # headroom under 64 MiB per-TC VMEM
    else:
        # v6e measured roofline plateau ~2 MiB; v5e scoped VMEM default is only
        # 16 MiB so stay small there too.  Unknown chips use the safe setting.
        block_bytes = 2 * 1024 * 1024
        vmem_limit = None
    native_half = gen is not None and gen >= 6   # v5e VPU/EUP has no bf16
    return dual_tc, block_bytes, vmem_limit, native_half


def _make_swish_kernel(compute_dtype):
    def kernel(x_ref, o_ref):
        x = x_ref[...].astype(compute_dtype)
        # sigmoid(x) == 0.5 * (tanh(0.5*x) + 1): one EUP transcendental plus
        # cheap VPU mul/add (no full-precision divide on the critical slot).
        y = x * (0.5 * (jnp.tanh(x * 0.5) + 1.0))
        o_ref[...] = y.astype(o_ref.dtype)
    return kernel


def _swish_2d(x2d, out_dtype, compute_dtype, dual_tc, block_bytes, vmem_limit):
    rows, W = x2d.shape
    itemsize = jnp.dtype(x2d.dtype).itemsize
    s = _sublane(x2d.dtype)
    bytes_per_row = W * itemsize

    # Rows per block capped by the target block size (sublane aligned).
    cap_rows = max(s, (block_bytes // bytes_per_row) // s * s)
    steps = pl.cdiv(rows, cap_rows)
    if dual_tc:
        # >= 2 blocks per TensorCore restores in-DMA / compute / out-DMA
        # overlap on each core; an even grid keeps the megacore split balanced.
        steps = max(steps, 4)
        if steps % 2:
            steps += 1
    # Each non-final block must hold at least one (sublane, 128) tile.
    steps = min(steps, max(1, rows // s))

    if steps <= 1:
        tr = rows                                # single full-extent block
    else:
        tr = min(rows, _round_up(pl.cdiv(rows, steps), s))
    grid = pl.cdiv(rows, tr)                     # edge block masked by Pallas

    n = rows * W
    cost = pl.CostEstimate(flops=4 * n, transcendentals=n,
                           bytes_accessed=2 * n * itemsize)
    cp_kwargs = dict(dimension_semantics=("parallel",))
    if vmem_limit is not None:
        cp_kwargs["vmem_limit_bytes"] = vmem_limit

    return pl.pallas_call(
        _make_swish_kernel(compute_dtype),
        out_shape=jax.ShapeDtypeStruct((rows, W), out_dtype),
        grid_spec=pltpu.PrefetchScalarGridSpec(
            num_scalar_prefetch=0,
            grid=(grid,),
            in_specs=[pl.BlockSpec((tr, W), lambda i: (i, 0))],
            out_specs=pl.BlockSpec((tr, W), lambda i: (i, 0)),
        ),
        compiler_params=pltpu.CompilerParams(**cp_kwargs),
        cost_estimate=cost,
    )(x2d)


def swish(x: jax.Array, *, min_pallas_bytes: int = 1 << 20) -> jax.Array:
    """Elementwise Swish (x * sigmoid(x)). Any shape; same shape/dtype out."""
    orig_shape = x.shape
    dtype = x.dtype
    n = x.size
    itemsize = jnp.dtype(dtype).itemsize

    def _xla(v):
        return (v * jax.nn.sigmoid(v)).astype(dtype)

    # Tiny inputs: fixed pallas_call overhead dominates — let XLA fuse it.
    if n == 0 or n * itemsize < min_pallas_bytes:
        return _xla(x)

    dual_tc, block_bytes, vmem_limit, native_half = _device_profile()
    if native_half and dtype in (jnp.bfloat16, jnp.float16):
        compute_dtype = dtype                  # halves EUP/VPU work on v6e/v7x
    else:
        compute_dtype = jnp.float32            # v5e (no bf16 EUP) / f32 / ints

    x_flat = jnp.ravel(x)                      # bitcast for contiguous inputs

    # Widest lane-dense slab width (multiple of 128) dividing n exactly.
    W = None
    for cand in (1024, 512, 256, 128):
        if n % cand == 0:
            W = cand
            break

    if W is not None:
        out2d = _swish_2d(x_flat.reshape(n // W, W), dtype, compute_dtype,
                          dual_tc, block_bytes, vmem_limit)
        return out2d.reshape(orig_shape)

    # Ragged (n % 128 != 0): Pallas on the 128-aligned prefix, XLA on the
    # <128-element tail.  Avoids jnp.pad (full extra read+write of the array).
    # TODO(synk): a scalar-prefetched length + masked last-block store would
    # also avoid the concatenate copy of the output.
    n_aligned = (n // _LANE) * _LANE
    if n_aligned == 0:
        return _xla(x)
    Wp = _LANE
    for cand in (1024, 512, 256):
        if n_aligned % cand == 0:
            Wp = cand
            break
    prefix = _swish_2d(x_flat[:n_aligned].reshape(n_aligned // Wp, Wp), dtype,
                       compute_dtype, dual_tc, block_bytes, vmem_limit)
    tail = _xla(x_flat[n_aligned:])
    return jnp.concatenate([prefix.reshape(-1), tail]).reshape(orig_shape)


if __name__ == "__main__":
    key = jax.random.PRNGKey(0)
    k0, k1, k2, k3 = jax.random.split(key, 4)

    # Small NCHW input consistent with typical conv-activation usage.
    x = jax.random.normal(k0, (2, 4, 16, 16), dtype=jnp.float32)
    y_ref = x * jax.nn.sigmoid(x)

    # Force the Pallas path even for this small example so the kernel runs.
    y = swish(x, min_pallas_bytes=0)
    jax.block_until_ready(y)
    assert y.shape == x.shape and y.dtype == x.dtype
    assert jnp.allclose(y, y_ref, atol=1e-5, rtol=1e-5)

    # Default path: tiny input bypasses Pallas (fused XLA elementwise).
    y_small = swish(x)
    assert jnp.allclose(y_small, y_ref, atol=1e-5, rtol=1e-5)

    # Ragged size with no 128-aligned prefix -> full XLA fallback.
    x_rag = jax.random.normal(k1, (3, 5, 7), dtype=jnp.float32)
    y_rag = swish(x_rag, min_pallas_bytes=0)
    jax.block_until_ready(y_rag)
    assert jnp.allclose(y_rag, x_rag * jax.nn.sigmoid(x_rag),
                        atol=1e-5, rtol=1e-5)

    # Ragged size with a 128-aligned prefix -> Pallas prefix + XLA tail.
    x_rag2 = jax.random.normal(k2, (2, 3, 43), dtype=jnp.float32)   # n = 258
    y_rag2 = swish(x_rag2, min_pallas_bytes=0)
    jax.block_until_ready(y_rag2)
    assert jnp.allclose(y_rag2, x_rag2 * jax.nn.sigmoid(x_rag2),
                        atol=1e-5, rtol=1e-5)

    # bf16 input: native bf16 compute on v6e/v7x, f32 path on v5e.
    x_bf = jax.random.normal(k3, (4, 256), dtype=jnp.bfloat16)
    y_bf = swish(x_bf, min_pallas_bytes=0)
    jax.block_until_ready(y_bf)
    xf = x_bf.astype(jnp.float32)
    y_bf_ref = (xf * jax.nn.sigmoid(xf)).astype(jnp.bfloat16)
    assert y_bf.dtype == jnp.bfloat16
    assert jnp.allclose(y_bf.astype(jnp.float32), y_bf_ref.astype(jnp.float32),
                        atol=2e-2, rtol=2e-2)

    print("KERNEL_OK")
</pallas_src>

<mosaic_0001>
module attributes {stable_mosaic.version = 11 : i64} {
  func.func @kernel(%arg0: i32, %arg1: memref<2x1024xf32, #tpu.memory_space<vmem>>, %arg2: memref<2x1024xf32, #tpu.memory_space<vmem>>) attributes {dimension_semantics = [#tpu.dimension_semantics<parallel>], iteration_bounds = array<i64: 1>, scalar_prefetch = 0 : i64, scratch_operands = 0 : i64, tpu.core_type = #tpu.core_type<tc>, window_params = [{transform_indices = @transform_0, window_bounds = array<i64: 2, 1024>}, {transform_indices = @transform_1, window_bounds = array<i64: 2, 1024>}]} {
    %c0 = arith.constant 0 : index
    %c0_0 = arith.constant 0 : index
    %0 = vector.load %arg1[%c0, %c0_0] : memref<2x1024xf32, #tpu.memory_space<vmem>>, vector<2x1024xf32>
    %cst = arith.constant 5.000000e-01 : f32
    %1 = vector.broadcast %cst : f32 to vector<2x1024xf32>
    %2 = arith.mulf %0, %1 : vector<2x1024xf32>
    %3 = math.tanh %2 : vector<2x1024xf32>
    %cst_1 = arith.constant 1.000000e+00 : f32
    %4 = vector.broadcast %cst_1 : f32 to vector<2x1024xf32>
    %5 = arith.addf %3, %4 : vector<2x1024xf32>
    %cst_2 = arith.constant 5.000000e-01 : f32
    %6 = vector.broadcast %cst_2 : f32 to vector<2x1024xf32>
    %7 = arith.mulf %6, %5 : vector<2x1024xf32>
    %8 = arith.mulf %0, %7 : vector<2x1024xf32>
    %c0_3 = arith.constant 0 : index
    %c0_4 = arith.constant 0 : index
    %9 = vector.load %arg2[%c0_3, %c0_4] : memref<2x1024xf32, #tpu.memory_space<vmem>>, vector<2x1024xf32>
    tpu.vector_store %arg2[%c0_3, %c0_4], %8 {strides = array<i32>} : memref<2x1024xf32, #tpu.memory_space<vmem>>, vector<2x1024xf32>,
    return
  }
  func.func @transform_0(%arg0: i32) -> (i32, i32) {
    %c0_i32 = arith.constant 0 : i32
    %c0_i32_0 = arith.constant 0 : i32
    return %arg0, %c0_i32 : i32, i32
  }
  func.func @transform_1(%arg0: i32) -> (i32, i32) {
    %c0_i32 = arith.constant 0 : i32
    %c0_i32_0 = arith.constant 0 : i32
    return %arg0, %c0_i32 : i32, i32
  }
}

</mosaic_0001>

<bundles_post_ra>
// kernel: tpu_custom_call.1
= control target key start
LH: loop header
LB: loop body
LE: loop exit
PB: predicated region body
PF: predicated region fallthrough
CT: control target
= control target key end

     0   :  { %6 = vsyncpa [#allocation3], 0  ;;  %s130_s0 = inlined_call_operand.hbm [shape: f32[2,1024], index: 0, kind: input, shape index: {}]   ;;  %s131_s1 = inlined_call_operand.hbm [shape: f32[2,1024], index: 1, kind: output, shape index: {}]  }
   0x1   :  { %7 = vsyncpa [#allocation4], 0  ;;  %s13_s8 = sshll.u32 %s130_s0, 4  ;;  %s112_s9 = smov [#allocation2]   ;;  %s14_s8 = int_to_ptr.hbm [resolvable:$true] %s13_s8 }
   0x2   :  { %s15_s10 = sshll.u32 %s112_s9, 4  ;;  %s16_s10 = int_to_ptr.vmem [resolvable:$true] %s15_s10 }
   0x3   :  { %18 = dma.hbm_to_vmem [thread:$0]  %s14_s8, 256, %s16_s10, [#allocation3]  }
   0x4   :  { %108 = dma.done.wait [#allocation3], 256  }
   0x5   :  { %109 = vsyncadd [#allocation3], 4294967040  ;;  %v23_v0 = vld [vmem:[#allocation2] sm:$0xff]  ;;  %v24_v1 = vld [vmem:[#allocation2 + $0x8] sm:$0xff]  ;;  %s113_s11 = smov [#allocation5]   ;;  %s44_s14 = sshll.u32 %s131_s1, 4  ;;  %s45_s14 = int_to_ptr.hbm [resolvable:$true] %s44_s14 }
   0x6   :  { %v25_v2 = vmul.f32 0.5, %v23_v0  ;;  %v26_v3 = vmul.f32 0.5, %v24_v1  ;;  %s42_s0 = sshll.u32 %s113_s11, 4  ;;  %s43_s0 = int_to_ptr.vmem [resolvable:$true] %s42_s0 }
   0x8   :  { %56 = vtanh.f32 %v25_v2 }
   0x9   :  { %58 = vtanh.f32 %v26_v3 }
   0xe   :  { %v57_v4 = vpop.eup %56 }
   0xf   :  { %v59_v5 = vpop.eup %58  ;;  %v29_v6 = vadd.f32 1.0, %v57_v4 }
  0x10   :  { %v30_v7 = vadd.f32 1.0, %v59_v5 }
  0x11   :  { %v31_v8 = vmul.f32 0.5, %v29_v6 }
  0x12   :  { %v32_v9 = vmul.f32 0.5, %v30_v7 }
  0x13   :  { %v33_v10 = vmul.f32 %v31_v8, %v23_v0 }
  0x14   :  { %v34_v11 = vmul.f32 %v32_v9, %v24_v1 }
  0x15   :  { %35 = vst [vmem:[#allocation5] sm:$0xff] %v33_v10 }
  0x16   :  { %36 = vst [vmem:[#allocation5 + $0x8] sm:$0xff] %v34_v11 }
  0x17   :  { %47 = dma.vmem_to_hbm [thread:$0]  %s43_s0, 256, %s45_s14, [#allocation4]  }
  0x18   :  { %110 = dma.done.wait [#allocation4], 256  }
  0x19   :  { %111 = vsyncadd [#allocation4], 4294967040 }
  0x1a   :  { %52 = vsyncpa [#allocation3], 1 }
  0x1b   :  { %53 = vsyncpa [#allocation4], 1 }

</bundles_post_ra>
